<compile_context>
chip_gen: v7x
topology: tpu7x:2x2x1
jax: 0.10.0
libtpu: 0.0.40
codegen_flags: <defaults>
</compile_context>

<pallas_src>
import numpy as np
import jax
import jax.numpy as jnp
from jax.experimental import pallas as pl
from jax.experimental.pallas import tpu as pltpu

# ----------------------------- module config (MLP defaults) ------------------
BOTTLENECK_WIDTH   = 256
NET_WIDTH_VIEWDIRS = 256
NET_DEPTH_VIEWDIRS = 2
SKIP_LAYER_DIR     = 0
NUM_RGB_CHANNELS   = 3
DEG_VIEW           = 4
DENSITY_BIAS       = -1.0
RGB_PREMULT        = 1.0
RGB_BIAS           = 0.0
RGB_PADDING        = 0.001

GRID_NUM_LEVELS    = 10          # int(log(8192/16)/log(2)) + 1
GRID_LEVEL_DIM     = 4
GRID_BASE_RES      = 16
GRID_DESIRED_RES   = 8192
GRID_LOG2_HASHMAP  = 16          # kwarg override (default 21) -> small table

DIM_DIR_ENC = 3 + 3 * 2 * DEG_VIEW               # pos_enc w/ append_identity = 27
FEAT_DIM    = GRID_NUM_LEVELS * GRID_LEVEL_DIM   # encoder output_dim = 40


def _grid_meta():
    growth = np.exp((np.log(GRID_DESIRED_RES) - np.log(GRID_BASE_RES))
                    / (GRID_NUM_LEVELS - 1))
    res, sizes, offs = [], [], [0]
    for l in range(GRID_NUM_LEVELS):
        R = int(np.ceil(GRID_BASE_RES * growth ** l))
        T = int(min(1 << GRID_LOG2_HASHMAP, (R + 1) ** 3))
        res.append(R)
        sizes.append(T)
        offs.append(offs[-1] + T)
    return res, sizes, offs[:-1], offs[-1]


GRID_RES, GRID_SIZES, GRID_OFFS, GRID_TOTAL = _grid_meta()
_PRIMES = (np.uint32(1), np.uint32(2654435761), np.uint32(805459861))


# ----------------------------- Pallas kernel ---------------------------------
def _mlp_kernel(feat_ref, dec0_ref, dec1_ref,
                w1_ref, b1_ref, w2_ref, b2_ref,
                wd0a_ref, wd1a_ref, wd1b_ref,
                wrgb_ref, brgb_ref,
                out_ref):
    f32, bf16 = jnp.float32, jnp.bfloat16

    tn = feat_ref.shape[0]          # rows (samples) in this tile
    tr = dec0_ref.shape[0]          # rays in this tile
    s = tn // tr                    # samples per ray (static)
    wdim = dec0_ref.shape[1]        # 256

    feat = feat_ref[...]            # (TN, 40) bf16

    # density_layer: Linear(40, 64) -> ReLU -> Linear(64, 256)
    h = jnp.dot(feat, w1_ref[...], preferred_element_type=f32) + b1_ref[...]
    h = jnp.maximum(h, 0.0)
    btl = jnp.dot(h.astype(bf16), w2_ref[...], preferred_element_type=f32) + b2_ref[...]

    # density = softplus(raw_density + density_bias), raw_density = btl[:, 0]
    raw = btl[:, 0:1] + DENSITY_BIAS
    density = jnp.maximum(raw, 0.0) + jnp.log1p(jnp.exp(-jnp.abs(raw)))

    # Per-ray dir-enc contributions (de @ W + b precomputed outside the kernel)
    # broadcast across the S samples of each ray (sublane broadcast).
    dec0 = jnp.broadcast_to(dec0_ref[...][:, None, :], (tr, s, wdim)).reshape(tn, wdim)
    dec1 = jnp.broadcast_to(dec1_ref[...][:, None, :], (tr, s, wdim)).reshape(tn, wdim)

    # Second stage (view-dependent MLP).  Concats are expressed as split
    # matmuls: layer0 input = [bottleneck, dir_enc]; layer1 input =
    # [h0, bottleneck, dir_enc] (skip at i == skip_layer_dir == 0).
    btl_b = btl.astype(bf16)
    h0 = jnp.dot(btl_b, wd0a_ref[...], preferred_element_type=f32) + dec0
    h0 = jnp.maximum(h0, 0.0)
    h1 = (jnp.dot(h0.astype(bf16), wd1a_ref[...], preferred_element_type=f32)
          + jnp.dot(btl_b, wd1b_ref[...], preferred_element_type=f32)
          + dec1)
    h1 = jnp.maximum(h1, 0.0)

    # rgb head, lane-padded to 4 outputs (column 0 has zero weights).
    raw_rgb = jnp.dot(h1.astype(bf16), wrgb_ref[...], preferred_element_type=f32) + brgb_ref[...]
    rgb4 = jax.nn.sigmoid(RGB_PREMULT * raw_rgb + RGB_BIAS)
    rgb4 = rgb4 * (1.0 + 2.0 * RGB_PADDING) - RGB_PADDING

    # Single lane-dense (TN, 4) block: full store, then overwrite column 0
    # with the density (avoids the previous iota/compare/select merge).
    out_ref[...] = rgb4
    out_ref[:, 0:1] = density


def mlp_heads_pallas(feat, dec0, dec1, params, *, samples_per_ray, tile_rows=1024):
    """feat: [N, 40] bf16; dec0/dec1: [B, 256] f32 (per-ray dir-enc contributions).

    Returns (density [N, 1], rgb [N, 3]) in f32.  Tiles are ray-aligned:
    tile_rays rays * S samples per grid step.  tile_rows (~1024) amortizes the
    ~0.35 us per-grid-step overhead on all generations while keeping the f32
    intermediates (a few MiB) well under the 40 MiB VMEM limit (v7x: 64 MiB/TC).
    """
    N, FD = feat.shape
    B, W = dec0.shape
    S = samples_per_ray
    assert N == B * S

    # Either tile_rays == B (blocks equal full array dims: always legal, grid=1)
    # or tile_rays is a multiple of 8 (satisfies the (8,128) sublane rule); the
    # partial tail tile is masked by Pallas, so no host-side padding is needed.
    tile_rays = max(1, tile_rows // S)
    if tile_rays >= B:
        tile_rays = B
    else:
        tile_rays = max(8, (tile_rays // 8) * 8)
    tn = tile_rays * S
    num_tiles = pl.cdiv(B, tile_rays)

    param_list = [params[k] for k in
                  ("w1", "b1", "w2", "b2", "wd0a", "wd1a", "wd1b", "wrgb", "brgb")]

    in_specs = [pl.BlockSpec((tn, FD), lambda i: (i, 0)),
                pl.BlockSpec((tile_rays, W), lambda i: (i, 0)),
                pl.BlockSpec((tile_rays, W), lambda i: (i, 0))]
    # weights/biases: constant index_map -> VMEM-resident across the grid
    in_specs += [pl.BlockSpec(p.shape, lambda i: (0, 0)) for p in param_list]

    out_spec = pl.BlockSpec((tn, 4), lambda i: (i, 0))
    out_shape = jax.ShapeDtypeStruct((N, 4), jnp.float32)

    flops_per_row = 2 * (FD * 64 + 64 * 256 + 3 * 256 * 256 + 256 * 4)
    param_bytes = sum(int(np.prod(p.shape)) * p.dtype.itemsize for p in param_list)
    cost = pl.CostEstimate(
        flops=int(N * flops_per_row),
        transcendentals=int(N * 8),
        bytes_accessed=int(N * (FD * 2 + 4 * 4) + 2 * B * W * 4 + param_bytes))

    out = pl.pallas_call(
        _mlp_kernel,
        grid=(num_tiles,),
        in_specs=in_specs,
        out_specs=out_spec,
        out_shape=out_shape,
        compiler_params=pltpu.CompilerParams(
            dimension_semantics=("parallel",),
            vmem_limit_bytes=40 * 1024 * 1024),
        cost_estimate=cost,
    )(feat, dec0, dec1, *param_list)

    return out[:, 0:1], out[:, 1:1 + NUM_RGB_CHANNELS]


# ----------------------------- plain-JAX glue ---------------------------------
def pos_enc(x, min_deg, max_deg):
    """coord.pos_enc with append_identity=True."""
    scales = 2.0 ** jnp.arange(min_deg, max_deg, dtype=jnp.float32)
    scaled = (x[..., None, :] * scales[:, None]).reshape(x.shape[:-1] + (-1,))
    four = jnp.sin(jnp.concatenate([scaled, scaled + 0.5 * jnp.pi], axis=-1))
    return jnp.concatenate([x, four], axis=-1)


def grid_encode(x, emb):
    """Multi-resolution hash-grid trilinear encoding. x: [P,3] in [-1,1]."""
    # TODO(synk): not bit-exact with the torch-ngp CUDA GridEncoder extension
    # (hash/resolution offsets differ slightly); shapes & semantics match.
    u = jnp.clip((x + 1.0) * 0.5, 0.0, 1.0)
    feats = []
    for l, R in enumerate(GRID_RES):
        T, off = GRID_SIZES[l], GRID_OFFS[l]
        pos = u * R
        p0 = jnp.floor(pos)
        frac = pos - p0
        p0 = p0.astype(jnp.int32)
        acc = jnp.zeros((x.shape[0], GRID_LEVEL_DIM), jnp.float32)
        dense = (R + 1) ** 3 <= T
        for corner in range(8):
            d = [(corner >> k) & 1 for k in range(3)]
            c = p0 + jnp.array(d, dtype=jnp.int32)
            if dense:
                idx = c[:, 0] + c[:, 1] * (R + 1) + c[:, 2] * (R + 1) ** 2
            else:
                cu = c.astype(jnp.uint32)
                h = (cu[:, 0] * _PRIMES[0]) ^ (cu[:, 1] * _PRIMES[1]) ^ (cu[:, 2] * _PRIMES[2])
                idx = (h % np.uint32(T)).astype(jnp.int32)
            w = jnp.ones((x.shape[0],), jnp.float32)
            for k in range(3):
                w = w * (frac[:, k] if d[k] else (1.0 - frac[:, k]))
            acc = acc + w[:, None] * emb[off + idx]
        feats.append(acc)
    return jnp.concatenate(feats, axis=-1)           # [P, L*D], level-major


def _linear_init(key, fan_in, fan_out, kaiming=False):
    kw, kb = jax.random.split(key)
    bw = np.sqrt(6.0 / fan_in) if kaiming else 1.0 / np.sqrt(fan_in)
    bb = 1.0 / np.sqrt(fan_in)
    w = jax.random.uniform(kw, (fan_in, fan_out), minval=-bw, maxval=bw, dtype=jnp.float32)
    b = jax.random.uniform(kb, (1, fan_out), minval=-bb, maxval=bb, dtype=jnp.float32)
    return w, b


def make_params(key):
    """Kernel matmul weights stored bf16; biases and XLA-side dir-enc slices f32."""
    ks = jax.random.split(key, 6)
    bf16 = jnp.bfloat16
    params = {}
    params["grid_emb"] = jax.random.uniform(
        ks[0], (GRID_TOTAL, GRID_LEVEL_DIM), minval=-1e-4, maxval=1e-4, dtype=jnp.float32)

    # density_layer: Linear(40,64) -> ReLU -> Linear(64,256)
    w1, b1 = _linear_init(ks[1], FEAT_DIM, 64)
    w2, b2 = _linear_init(ks[2], 64, BOTTLENECK_WIDTH)
    params["w1"], params["b1"] = w1.astype(bf16), b1
    params["w2"], params["b2"] = w2.astype(bf16), b2

    # lin_second_stage_0: Linear(256+27, 256) (kaiming).  Bottleneck rows go to
    # the kernel; the 27 dir-enc rows stay f32 for the per-ray XLA precompute.
    in0 = BOTTLENECK_WIDTH + DIM_DIR_ENC
    wd0, bd0 = _linear_init(ks[3], in0, NET_WIDTH_VIEWDIRS, kaiming=True)
    params["wd0a"] = wd0[:BOTTLENECK_WIDTH].astype(bf16)
    params["wd0b"] = wd0[BOTTLENECK_WIDTH:]                     # (27, 256) f32
    params["bd0"] = bd0

    # lin_second_stage_1: Linear(256 + (256+27), 256) (kaiming)
    in1 = NET_WIDTH_VIEWDIRS + in0
    wd1, bd1 = _linear_init(ks[4], in1, NET_WIDTH_VIEWDIRS, kaiming=True)
    params["wd1a"] = wd1[:NET_WIDTH_VIEWDIRS].astype(bf16)
    params["wd1b"] = wd1[NET_WIDTH_VIEWDIRS:NET_WIDTH_VIEWDIRS + BOTTLENECK_WIDTH].astype(bf16)
    params["wd1c"] = wd1[NET_WIDTH_VIEWDIRS + BOTTLENECK_WIDTH:]  # (27, 256) f32
    params["bd1"] = bd1

    # rgb_layer: Linear(256, 3), lane-padded to width 4 (column 0 unused/zero)
    wrgb, brgb = _linear_init(ks[5], NET_WIDTH_VIEWDIRS, NUM_RGB_CHANNELS)
    params["wrgb"] = jnp.pad(wrgb, ((0, 0), (1, 0))).astype(bf16)   # (256, 4)
    params["brgb"] = jnp.pad(brgb, ((0, 0), (1, 0)))                # (1, 4) f32
    return params


def mlp_forward(params, means, stds, viewdirs):
    """means: [B,S,n,3], stds: [B,S,n], viewdirs: [B,3]  (rand=False, no_warp=True)."""
    B, S, n, _ = means.shape
    N = B * S

    # ---- predict_density (no_warp=True, rand=False, scale_featurization off) ----
    raw_feat = grid_encode(means.reshape(-1, 3), params["grid_emb"])     # [N*n, 40]
    raw_feat = raw_feat.reshape(N, n, GRID_NUM_LEVELS, GRID_LEVEL_DIM)

    grid_sizes = jnp.asarray(GRID_RES, jnp.float32)
    w = jax.lax.erf(1.0 / jnp.sqrt(8.0 * (stds.reshape(N, n)[..., None] ** 2)
                                   * grid_sizes ** 2))                   # [N, n, L]
    # erf-weighted sample mean fused into the XLA encoder fusion
    feat = (raw_feat * w[..., None]).mean(axis=1).reshape(N, FEAT_DIM)   # [N, 40]
    feat = feat.astype(jnp.bfloat16)

    # ---- view-direction encoding (use_directional_enc=False -> pos_enc) ----
    # Per-ray contributions of the dir-enc columns of both second-stage layers
    # (folded with their biases): computed once per ray here, broadcast to the
    # S samples inside the kernel.  Removes two K=32 MXU passes per sample.
    de = pos_enc(viewdirs, 0, DEG_VIEW)                                  # [B, 27]
    dec0 = de @ params["wd0b"] + params["bd0"]                           # [B, 256] f32
    dec1 = de @ params["wd1c"] + params["bd1"]                           # [B, 256] f32

    density, rgb = mlp_heads_pallas(feat, dec0, dec1, params, samples_per_ray=S)

    # TODO(synk): raw_grad_density / normals need torch.autograd.grad through the
    # hash grid (disable_density_normals=True config used instead).
    return dict(
        coord=means.mean(axis=-2),
        density=density.reshape(B, S),
        rgb=rgb.reshape(B, S, NUM_RGB_CHANNELS),
        raw_grad_density=None,
        grad_pred=None,
        normals=None,
        normals_pred=None,
        roughness=None,
    )


if __name__ == "__main__":
    key = jax.random.PRNGKey(0)
    k1, k2, k3, k4 = jax.random.split(key, 4)

    B, S, n = 2, 8, 4                       # 16 rays, 4 gaussian samples each
    means = jax.random.uniform(k1, (B, S, n, 3), minval=-0.9, maxval=0.9, dtype=jnp.float32)
    stds = jax.random.uniform(k2, (B, S, n), minval=0.01, maxval=0.1, dtype=jnp.float32)
    viewdirs = jax.random.normal(k3, (B, 3), dtype=jnp.float32)
    viewdirs = viewdirs / jnp.linalg.norm(viewdirs, axis=-1, keepdims=True)

    params = make_params(k4)
    out = mlp_forward(params, means, stds, viewdirs)
    jax.block_until_ready((out["density"], out["rgb"], out["coord"]))
    assert out["density"].shape == (B, S)
    assert out["rgb"].shape == (B, S, 3)
    assert out["coord"].shape == (B, S, 3)
    assert bool(jnp.all(jnp.isfinite(out["density"]))) and bool(jnp.all(jnp.isfinite(out["rgb"])))
    print("KERNEL_OK")
</pallas_src>

<mosaic_0001>
module attributes {stable_mosaic.version = 11 : i64} {
  func.func @_mlp_kernel(%arg0: i32, %arg1: memref<16x40xbf16, #tpu.memory_space<vmem>>, %arg2: memref<2x256xf32, #tpu.memory_space<vmem>>, %arg3: memref<2x256xf32, #tpu.memory_space<vmem>>, %arg4: memref<40x64xbf16, #tpu.memory_space<vmem>>, %arg5: memref<1x64xf32, #tpu.memory_space<vmem>>, %arg6: memref<64x256xbf16, #tpu.memory_space<vmem>>, %arg7: memref<1x256xf32, #tpu.memory_space<vmem>>, %arg8: memref<256x256xbf16, #tpu.memory_space<vmem>>, %arg9: memref<256x256xbf16, #tpu.memory_space<vmem>>, %arg10: memref<256x256xbf16, #tpu.memory_space<vmem>>, %arg11: memref<256x4xbf16, #tpu.memory_space<vmem>>, %arg12: memref<1x4xf32, #tpu.memory_space<vmem>>, %arg13: memref<16x4xf32, #tpu.memory_space<vmem>>) attributes {dimension_semantics = [#tpu.dimension_semantics<parallel>], iteration_bounds = array<i64: 1>, scalar_prefetch = 0 : i64, scratch_operands = 0 : i64, tpu.core_type = #tpu.core_type<tc>, window_params = [{transform_indices = @transform_0, window_bounds = array<i64: 16, 40>}, {transform_indices = @transform_1, window_bounds = array<i64: 2, 256>}, {transform_indices = @transform_2, window_bounds = array<i64: 2, 256>}, {pipeline_mode = #tpu.pipeline_mode<synchronous>, transform_indices = @transform_3, window_bounds = array<i64: 40, 64>}, {pipeline_mode = #tpu.pipeline_mode<synchronous>, transform_indices = @transform_4, window_bounds = array<i64: 1, 64>}, {pipeline_mode = #tpu.pipeline_mode<synchronous>, transform_indices = @transform_5, window_bounds = array<i64: 64, 256>}, {pipeline_mode = #tpu.pipeline_mode<synchronous>, transform_indices = @transform_6, window_bounds = array<i64: 1, 256>}, {pipeline_mode = #tpu.pipeline_mode<synchronous>, transform_indices = @transform_7, window_bounds = array<i64: 256, 256>}, {pipeline_mode = #tpu.pipeline_mode<synchronous>, transform_indices = @transform_8, window_bounds = array<i64: 256, 256>}, {pipeline_mode = #tpu.pipeline_mode<synchronous>, transform_indices = @transform_9, window_bounds = array<i64: 256, 256>}, {pipeline_mode = #tpu.pipeline_mode<synchronous>, transform_indices = @transform_10, window_bounds = array<i64: 256, 4>}, {pipeline_mode = #tpu.pipeline_mode<synchronous>, transform_indices = @transform_11, window_bounds = array<i64: 1, 4>}, {transform_indices = @transform_12, window_bounds = array<i64: 16, 4>}]} {
    %c0 = arith.constant 0 : index
    %c0_0 = arith.constant 0 : index
    %0 = vector.load %arg1[%c0, %c0_0] : memref<16x40xbf16, #tpu.memory_space<vmem>>, vector<16x40xbf16>
    %c0_1 = arith.constant 0 : index
    %c0_2 = arith.constant 0 : index
    %1 = vector.load %arg4[%c0_1, %c0_2] : memref<40x64xbf16, #tpu.memory_space<vmem>>, vector<40x64xbf16>
    %cst = arith.constant dense<0.000000e+00> : vector<16x64xf32>
    %2 = tpu.matmul %0, %1, %cst {dimension_numbers = #tpu.dot_dimension_numbers<[1], [0], [0], [1], [0, 0, 1, 1], [], []>} : vector<16x40xbf16>, vector<40x64xbf16>, vector<16x64xf32> -> vector<16x64xf32>
    %c0_3 = arith.constant 0 : index
    %c0_4 = arith.constant 0 : index
    %3 = vector.load %arg5[%c0_3, %c0_4] : memref<1x64xf32, #tpu.memory_space<vmem>>, vector<1x64xf32>
    %4 = vector.broadcast %3 : vector<1x64xf32> to vector<16x64xf32>
    %5 = arith.addf %2, %4 : vector<16x64xf32>
    %cst_5 = arith.constant 0.000000e+00 : f32
    %6 = vector.broadcast %cst_5 : f32 to vector<16x64xf32>
    %7 = arith.maximumf %5, %6 : vector<16x64xf32>
    %8 = arith.truncf %7 : vector<16x64xf32> to vector<16x64xbf16>
    %c0_6 = arith.constant 0 : index
    %c0_7 = arith.constant 0 : index
    %9 = vector.load %arg6[%c0_6, %c0_7] : memref<64x256xbf16, #tpu.memory_space<vmem>>, vector<64x256xbf16>
    %cst_8 = arith.constant dense<0.000000e+00> : vector<16x256xf32>
    %10 = tpu.matmul %8, %9, %cst_8 {dimension_numbers = #tpu.dot_dimension_numbers<[1], [0], [0], [1], [0, 0, 1, 1], [], []>} : vector<16x64xbf16>, vector<64x256xbf16>, vector<16x256xf32> -> vector<16x256xf32>
    %c0_9 = arith.constant 0 : index
    %c0_10 = arith.constant 0 : index
    %11 = vector.load %arg7[%c0_9, %c0_10] : memref<1x256xf32, #tpu.memory_space<vmem>>, vector<1x256xf32>
    %12 = vector.broadcast %11 : vector<1x256xf32> to vector<16x256xf32>
    %13 = arith.addf %10, %12 : vector<16x256xf32>
    %14 = vector.extract_strided_slice %13 {offsets = [0, 0], sizes = [16, 1], strides = [1, 1]} : vector<16x256xf32> to vector<16x1xf32>
    %cst_11 = arith.constant -1.000000e+00 : f32
    %15 = vector.broadcast %cst_11 : f32 to vector<16x1xf32>
    %16 = arith.addf %14, %15 : vector<16x1xf32>
    %cst_12 = arith.constant 0.000000e+00 : f32
    %17 = vector.broadcast %cst_12 : f32 to vector<16x1xf32>
    %18 = arith.maximumf %16, %17 : vector<16x1xf32>
    %19 = math.absf %16 : vector<16x1xf32>
    %cst_13 = arith.constant 0.000000e+00 : f32
    %20 = vector.broadcast %cst_13 : f32 to vector<16x1xf32>
    %21 = arith.subf %20, %19 : vector<16x1xf32>
    %22 = math.exp %21 : vector<16x1xf32>
    %23 = math.log1p %22 : vector<16x1xf32>
    %24 = arith.addf %18, %23 : vector<16x1xf32>
    %c0_14 = arith.constant 0 : index
    %c0_15 = arith.constant 0 : index
    %25 = vector.load %arg2[%c0_14, %c0_15] : memref<2x256xf32, #tpu.memory_space<vmem>>, vector<2x256xf32>
    %26 = vector.shape_cast %25 : vector<2x256xf32> to vector<2x1x256xf32>
    %27 = vector.shape_cast %26 : vector<2x1x256xf32> to vector<2x1x256xf32>
    %28 = vector.broadcast %27 : vector<2x1x256xf32> to vector<2x8x256xf32>
    %29 = vector.shape_cast %28 : vector<2x8x256xf32> to vector<16x256xf32>
    %c0_16 = arith.constant 0 : index
    %c0_17 = arith.constant 0 : index
    %30 = vector.load %arg3[%c0_16, %c0_17] : memref<2x256xf32, #tpu.memory_space<vmem>>, vector<2x256xf32>
    %31 = vector.shape_cast %30 : vector<2x256xf32> to vector<2x1x256xf32>
    %32 = vector.shape_cast %31 : vector<2x1x256xf32> to vector<2x1x256xf32>
    %33 = vector.broadcast %32 : vector<2x1x256xf32> to vector<2x8x256xf32>
    %34 = vector.shape_cast %33 : vector<2x8x256xf32> to vector<16x256xf32>
    %35 = arith.truncf %13 : vector<16x256xf32> to vector<16x256xbf16>
    %c0_18 = arith.constant 0 : index
    %c0_19 = arith.constant 0 : index
    %36 = vector.load %arg8[%c0_18, %c0_19] : memref<256x256xbf16, #tpu.memory_space<vmem>>, vector<256x256xbf16>
    %cst_20 = arith.constant dense<0.000000e+00> : vector<16x256xf32>
    %37 = tpu.matmul %35, %36, %cst_20 {dimension_numbers = #tpu.dot_dimension_numbers<[1], [0], [0], [1], [0, 0, 1, 1], [], []>} : vector<16x256xbf16>, vector<256x256xbf16>, vector<16x256xf32> -> vector<16x256xf32>
    %38 = arith.addf %37, %29 : vector<16x256xf32>
    %cst_21 = arith.constant 0.000000e+00 : f32
    %39 = vector.broadcast %cst_21 : f32 to vector<16x256xf32>
    %40 = arith.maximumf %38, %39 : vector<16x256xf32>
    %41 = arith.truncf %40 : vector<16x256xf32> to vector<16x256xbf16>
    %c0_22 = arith.constant 0 : index
    %c0_23 = arith.constant 0 : index
    %42 = vector.load %arg9[%c0_22, %c0_23] : memref<256x256xbf16, #tpu.memory_space<vmem>>, vector<256x256xbf16>
    %cst_24 = arith.constant dense<0.000000e+00> : vector<16x256xf32>
    %43 = tpu.matmul %41, %42, %cst_24 {dimension_numbers = #tpu.dot_dimension_numbers<[1], [0], [0], [1], [0, 0, 1, 1], [], []>} : vector<16x256xbf16>, vector<256x256xbf16>, vector<16x256xf32> -> vector<16x256xf32>
    %c0_25 = arith.constant 0 : index
    %c0_26 = arith.constant 0 : index
    %44 = vector.load %arg10[%c0_25, %c0_26] : memref<256x256xbf16, #tpu.memory_space<vmem>>, vector<256x256xbf16>
    %cst_27 = arith.constant dense<0.000000e+00> : vector<16x256xf32>
    %45 = tpu.matmul %35, %44, %cst_27 {dimension_numbers = #tpu.dot_dimension_numbers<[1], [0], [0], [1], [0, 0, 1, 1], [], []>} : vector<16x256xbf16>, vector<256x256xbf16>, vector<16x256xf32> -> vector<16x256xf32>
    %46 = arith.addf %43, %45 : vector<16x256xf32>
    %47 = arith.addf %46, %34 : vector<16x256xf32>
    %cst_28 = arith.constant 0.000000e+00 : f32
    %48 = vector.broadcast %cst_28 : f32 to vector<16x256xf32>
    %49 = arith.maximumf %47, %48 : vector<16x256xf32>
    %50 = arith.truncf %49 : vector<16x256xf32> to vector<16x256xbf16>
    %c0_29 = arith.constant 0 : index
    %c0_30 = arith.constant 0 : index
    %51 = vector.load %arg11[%c0_29, %c0_30] : memref<256x4xbf16, #tpu.memory_space<vmem>>, vector<256x4xbf16>
    %cst_31 = arith.constant dense<0.000000e+00> : vector<16x4xf32>
    %52 = tpu.matmul %50, %51, %cst_31 {dimension_numbers = #tpu.dot_dimension_numbers<[1], [0], [0], [1], [0, 0, 1, 1], [], []>} : vector<16x256xbf16>, vector<256x4xbf16>, vector<16x4xf32> -> vector<16x4xf32>
    %c0_32 = arith.constant 0 : index
    %c0_33 = arith.constant 0 : index
    %53 = vector.load %arg12[%c0_32, %c0_33] : memref<1x4xf32, #tpu.memory_space<vmem>>, vector<1x4xf32>
    %54 = vector.broadcast %53 : vector<1x4xf32> to vector<16x4xf32>
    %55 = arith.addf %52, %54 : vector<16x4xf32>
    %cst_34 = arith.constant 1.000000e+00 : f32
    %56 = vector.broadcast %cst_34 : f32 to vector<16x4xf32>
    %57 = arith.mulf %56, %55 : vector<16x4xf32>
    %cst_35 = arith.constant 0.000000e+00 : f32
    %58 = vector.broadcast %cst_35 : f32 to vector<16x4xf32>
    %59 = arith.addf %57, %58 : vector<16x4xf32>
    %60 = arith.negf %59 : vector<16x4xf32>
    %61 = math.exp %60 : vector<16x4xf32>
    %cst_36 = arith.constant 1.000000e+00 : f32
    %62 = vector.broadcast %cst_36 : f32 to vector<16x4xf32>
    %63 = arith.addf %62, %61 : vector<16x4xf32>
    %64 = arith.divf %62, %63 : vector<16x4xf32>
    %cst_37 = arith.constant 1.002000e+00 : f32
    %65 = vector.broadcast %cst_37 : f32 to vector<16x4xf32>
    %66 = arith.mulf %64, %65 : vector<16x4xf32>
    %cst_38 = arith.constant 1.000000e-03 : f32
    %67 = vector.broadcast %cst_38 : f32 to vector<16x4xf32>
    %68 = arith.subf %66, %67 : vector<16x4xf32>
    %c0_39 = arith.constant 0 : index
    %c0_40 = arith.constant 0 : index
    %69 = vector.load %arg13[%c0_39, %c0_40] : memref<16x4xf32, #tpu.memory_space<vmem>>, vector<16x4xf32>
    tpu.vector_store %arg13[%c0_39, %c0_40], %68 {strides = array<i32>} : memref<16x4xf32, #tpu.memory_space<vmem>>, vector<16x4xf32>,
    %c0_41 = arith.constant 0 : index
    %c0_42 = arith.constant 0 : index
    %70 = vector.load %arg13[%c0_41, %c0_42] : memref<16x4xf32, #tpu.memory_space<vmem>>, vector<16x1xf32>
    tpu.vector_store %arg13[%c0_41, %c0_42], %24 {strides = array<i32>} : memref<16x4xf32, #tpu.memory_space<vmem>>, vector<16x1xf32>,
    return
  }
  func.func @transform_0(%arg0: i32) -> (i32, i32) {
    %c0_i32 = arith.constant 0 : i32
    %c0_i32_0 = arith.constant 0 : i32
    return %arg0, %c0_i32 : i32, i32
  }
  func.func @transform_1(%arg0: i32) -> (i32, i32) {
    %c0_i32 = arith.constant 0 : i32
    %c0_i32_0 = arith.constant 0 : i32
    return %arg0, %c0_i32 : i32, i32
  }
  func.func @transform_2(%arg0: i32) -> (i32, i32) {
    %c0_i32 = arith.constant 0 : i32
    %c0_i32_0 = arith.constant 0 : i32
    return %arg0, %c0_i32 : i32, i32
  }
  func.func @transform_3(%arg0: i32) -> (i32, i32) {
    %c0_i32 = arith.constant 0 : i32
    %c0_i32_0 = arith.constant 0 : i32
    %c0_i32_1 = arith.constant 0 : i32
    return %c0_i32, %c0_i32_0 : i32, i32
  }
  func.func @transform_4(%arg0: i32) -> (i32, i32) {
    %c0_i32 = arith.constant 0 : i32
    %c0_i32_0 = arith.constant 0 : i32
    %c0_i32_1 = arith.constant 0 : i32
    return %c0_i32, %c0_i32_0 : i32, i32
  }
  func.func @transform_5(%arg0: i32) -> (i32, i32) {
    %c0_i32 = arith.constant 0 : i32
    %c0_i32_0 = arith.constant 0 : i32
    %c0_i32_1 = arith.constant 0 : i32
    return %c0_i32, %c0_i32_0 : i32, i32
  }
  func.func @transform_6(%arg0: i32) -> (i32, i32) {
    %c0_i32 = arith.constant 0 : i32
    %c0_i32_0 = arith.constant 0 : i32
    %c0_i32_1 = arith.constant 0 : i32
    return %c0_i32, %c0_i32_0 : i32, i32
  }
  func.func @transform_7(%arg0: i32) -> (i32, i32) {
    %c0_i32 = arith.constant 0 : i32
    %c0_i32_0 = arith.constant 0 : i32
    %c0_i32_1 = arith.constant 0 : i32
    return %c0_i32, %c0_i32_0 : i32, i32
  }
  func.func @transform_8(%arg0: i32) -> (i32, i32) {
    %c0_i32 = arith.constant 0 : i32
    %c0_i32_0 = arith.constant 0 : i32
    %c0_i32_1 = arith.constant 0 : i32
    return %c0_i32, %c0_i32_0 : i32, i32
  }
  func.func @transform_9(%arg0: i32) -> (i32, i32) {
    %c0_i32 = arith.constant 0 : i32
    %c0_i32_0 = arith.constant 0 : i32
    %c0_i32_1 = arith.constant 0 : i32
    return %c0_i32, %c0_i32_0 : i32, i32
  }
  func.func @transform_10(%arg0: i32) -> (i32, i32) {
    %c0_i32 = arith.constant 0 : i32
    %c0_i32_0 = arith.constant 0 : i32
    %c0_i32_1 = arith.constant 0 : i32
    return %c0_i32, %c0_i32_0 : i32, i32
  }
  func.func @transform_11(%arg0: i32) -> (i32, i32) {
    %c0_i32 = arith.constant 0 : i32
    %c0_i32_0 = arith.constant 0 : i32
    %c0_i32_1 = arith.constant 0 : i32
    return %c0_i32, %c0_i32_0 : i32, i32
  }
  func.func @transform_12(%arg0: i32) -> (i32, i32) {
    %c0_i32 = arith.constant 0 : i32
    %c0_i32_0 = arith.constant 0 : i32
    return %arg0, %c0_i32 : i32, i32
  }
}

</mosaic_0001>

<bundles_post_ra>
// kernel: tpu_custom_call.1
= control target key start
LH: loop header
LB: loop body
LE: loop exit
PB: predicated region body
PF: predicated region fallthrough
CT: control target
= control target key end

     0   :  { %17 = vsyncpa [#allocation3], 0  ;;  %s2003_s0 = inlined_call_operand.vmem [shape: bf16[16,40], index: 0, kind: input, shape index: {}]   ;;  %s2004_s1 = inlined_call_operand.vmem [shape: f32[2,256], index: 1, kind: input, shape index: {}]   ;;  %s2005_s2 = inlined_call_operand.vmem [shape: f32[2,256], index: 2, kind: input, shape index: {}]   ;;  %s2006_s3 = inlined_call_operand.vmem [shape: bf16[40,64], index: 3, kind: input, shape index: {}]   ;;  %s2007_s4 = inlined_call_operand.vmem [shape: f32[1,64], index: 4, kind: input, shape index: {}]   ;;  %s2008_s5 = inlined_call_operand.vmem [shape: bf16[64,256], index: 5, kind: input, shape index: {}]   ;;  %s2009_s6 = inlined_call_operand.vmem [shape: f32[1,256], index: 6, kind: input, shape index: {}]   ;;  %s2010_s7 = inlined_call_operand.hbm [shape: bf16[256,256], index: 7, kind: input, shape index: {}]   ;;  %s2011_s8 = inlined_call_operand.hbm [shape: bf16[256,256], index: 8, kind: input, shape index: {}]   ;;  %s2012_s9 = inlined_call_operand.hbm [shape: bf16[256,256], index: 9, kind: input, shape index: {}]   ;;  %s2013_s10 = inlined_call_operand.vmem [shape: bf16[256,4], index: 10, kind: input, shape index: {}]   ;;  %s2014_s11 = inlined_call_operand.vmem [shape: f32[1,4], index: 11, kind: input, shape index: {}]   ;;  %s2015_s12 = inlined_call_operand.vmem [shape: f32[16,4], index: 12, kind: output, shape index: {}]  }
   0x1   :  { %18 = vsyncpa [#allocation5], 0  ;;  %s1741_s21 = smov [#allocation4]   ;;  %s1742_s23 = smov [#allocation2]  }
   0x2   :  { %s50_s22 = sshll.u32 %s1741_s21, 4  ;;  %s38_s24 = sshll.u32 %s1742_s23, 4  ;;  %s51_s22 = int_to_ptr.vmem [resolvable:$true] %s50_s22  ;;  %s1814_s24 = int_to_ptr.vmem [resolvable:$true] %s38_s24 }
   0x3   :  { %s1671_s27 = scalar_lea.hbm %s2011_s8, 4096 }
   0x4   :  { %p1672_p0 = scmp.ne.s32.totalorder %s2011_s8, %s1671_s27  ;;  %p1675_p1 = scmp.lt.u32.totalorder %s1671_s27, %s2011_s8 }
   0x6   :  { %p1677_p2 = pnand %p1675_p1, %p1672_p0 }
   0x8   :  { %1680 = shalt.err (!%p1677_p2)
}
   0x9   :  { %s1681_s14 = scalar_lea.vmem %s51_s22, 4096  ;;  %p1686_p4 = scmp.lt.s32.totalorder %s51_s22, %s51_s22 }
   0xa   :  { %p1682_p3 = scmp.ne.s32.totalorder %s51_s22, %s1681_s14  ;;  %p1687_p5 = scmp.lt.s32.totalorder %s1681_s14, %s1681_s14 }
   0xc   :  { %p1688_p6 = por %p1687_p5, %p1686_p4 }
   0xe   :  { %p1689_p7 = pnand %p1688_p6, %p1682_p3 }
  0x10   :  { %1692 = shalt.err (!%p1689_p7)
}
  0x11   :  { %s1743_s15 = smov 128   ;;  %s1744_s16 = smov 8  }
  0x12   :  { %56 = dma.hbm_to_vmem [thread:$0]  %s2011_s8, 4096, %s51_s22, [#allocation5], %s1743_s15, %s1743_s15, %s1744_s16  }
  0x13   :  { %s1693_s21 = scalar_lea.hbm %s2010_s7, 4096 }
  0x14   :  { %p1694_p8 = scmp.ne.s32.totalorder %s2010_s7, %s1693_s21  ;;  %p1697_p9 = scmp.lt.u32.totalorder %s1693_s21, %s2010_s7 }
  0x16   :  { %p1699_p10 = pnand %p1697_p9, %p1694_p8 }
  0x18   :  { %1702 = shalt.err (!%p1699_p10)
}
  0x19   :  { %s1703_s28 = scalar_lea.vmem %s1814_s24, 4096  ;;  %p1708_p12 = scmp.lt.s32.totalorder %s1814_s24, %s1814_s24 }
  0x1a   :  { %p1704_p11 = scmp.ne.s32.totalorder %s1814_s24, %s1703_s28  ;;  %p1709_p13 = scmp.lt.s32.totalorder %s1703_s28, %s1703_s28 }
  0x1c   :  { %p1710_p0 = por %p1709_p13, %p1708_p12 }
  0x1e   :  { %p1711_p1 = pnand %p1710_p0, %p1704_p11 }
  0x20   :  { %1714 = shalt.err (!%p1711_p1)
}
  0x21   :  { %44 = dma.hbm_to_vmem [thread:$0]  %s2010_s7, 4096, %s1814_s24, [#allocation3], %s1743_s15, %s1743_s15, %s1744_s16  }
  0x22   :  { %s1745_s29 = smov [#allocation6]   ;;  %s1715_s17 = scalar_lea.hbm %s2012_s9, 4096 }
  0x23   :  { %s62_s30 = sshll.u32 %s1745_s29, 4  ;;  %p1716_p2 = scmp.ne.s32.totalorder %s2012_s9, %s1715_s17  ;;  %s63_s30 = int_to_ptr.vmem [resolvable:$true] %s62_s30 }
  0x24   :  { %p1719_p3 = scmp.lt.u32.totalorder %s1715_s17, %s2012_s9 }
  0x26   :  { %p1721_p4 = pnand %p1719_p3, %p1716_p2 }
  0x28   :  { %1724 = shalt.err (!%p1721_p4)
}
  0x29   :  { %s1725_s23 = scalar_lea.vmem %s63_s30, 4096  ;;  %p1730_p6 = scmp.lt.s32.totalorder %s63_s30, %s63_s30 }
  0x2a   :  { %p1726_p5 = scmp.ne.s32.totalorder %s63_s30, %s1725_s23  ;;  %p1731_p7 = scmp.lt.s32.totalorder %s1725_s23, %s1725_s23 }
  0x2c   :  { %p1732_p8 = por %p1731_p7, %p1730_p6 }
  0x2e   :  { %p1733_p9 = pnand %p1732_p8, %p1726_p5 }
  0x30   :  { %1736 = shalt.err (!%p1733_p9)
}
  0x31   :  { %68 = dma.hbm_to_vmem [thread:$0]  %s2012_s9, 4096, %s63_s30, [#allocation5], %s1743_s15, %s1743_s15, %s1744_s16  }
  0x32   :  { %1737 = dma.done.wait [#allocation3], 4096  }
  0x33   :  { %1738 = vsyncadd [#allocation3], 4294963200 }
  0x34   :  { %1739 = dma.done.wait [#allocation5], 8192  }
  0x35   :  { %1740 = vsyncadd [#allocation5], 4294959104  ;;  %v1746_v0 = vmov 0.0   ;;  %vm1747_vm0 = vmmov 0   ;;  %v1479_v1 = vld [vmem:[%s2006_s3] sm:$0xff]   ;;  %v1480_v2 = vld [vmem:[%s2006_s3 + $0x8] sm:$0xff]  }
  0x36   :  { %1457 = vmatprep.subr.bf16.mxu0 %v1746_v0  ;;  %1463 = vmatprep.mubr.msk.bf16.mxu0 %vm1747_vm0, %v1746_v0  ;;  %v1481_v3 = vld [vmem:[%s2006_s3 + $0x10] ss:$0 sps:$4 sm:$0xff]   ;;  %vm121_vm1 = vcmask 1043456   ;;  %v1485_v4 = vld [vmem:[%s2008_s5 + $0x4] ss:$8 sps:$4 sm:$0xff]   ;;  %vm117_vm2 = vcmask 326656  }
  0x37   :  { %1458 = vmatpush3.bf16.msra.mxu0 %v1479_v1  ;;  %v123_v5 = vsel %vm121_vm1, %v1481_v3, 0  ;;  %v1482_v6 = vld [vmem:[%s2003_s0] sm:$0xff]   ;;  %v1488_v8 = vld [vmem:[%s2008_s5 + $0x14] ss:$8 sps:$4 sm:$0xff]   ;;  %v1486_v9 = vld [vmem:[%s2008_s5 + $0x10] ss:$8 sps:$4 sm:$0xff]  }
  0x38   :  { %1459 = vmatprep.subr.bf16.mxu0 %v1746_v0  ;;  %v1483_v7 = vld [vmem:[%s2008_s5] ss:$8 sps:$4 sm:$0xff]   ;;  %v1491_v10 = vld [vmem:[%s2008_s5 + $0x24] ss:$8 sps:$4 sm:$0xff]   ;;  %v1494_v12 = vld [vmem:[%s2008_s5 + $0x34] ss:$8 sps:$4 sm:$0xff]  }
  0x39   :  { %v1489_v11 = vld [vmem:[%s2008_s5 + $0x20] ss:$8 sps:$4 sm:$0xff]   ;;  %v1492_v13 = vld [vmem:[%s2008_s5 + $0x30] ss:$8 sps:$4 sm:$0xff]   ;;  %v1748_v14 = vmov 0   ;;  %vm229_vm3 = vcmask 523264  }
  0x3a   :  { %v1497_v15 = vld [vmem:[#allocation2 + $0x4] ss:$8 sps:$4 sm:$0xff]   ;;  %v1500_v17 = vld [vmem:[#allocation6] ss:$8 sps:$4 sm:$0xff]   ;;  %v1504_v18 = vld [vmem:[#allocation6 + $0x14] ss:$8 sps:$4 sm:$0xff]  }
  0x3b   :  { %1460 = vmatpush3.bf16.msra.mxu0 %v1480_v2  ;;  %v1498_v16 = vld [vmem:[#allocation6 + $0x4] ss:$8 sps:$4 sm:$0xff]   ;;  %v1506_v19 = vld [vmem:[#allocation6 + $0x10] ss:$8 sps:$4 sm:$0xff]   ;;  %v1512_v21 = vld [vmem:[#allocation6 + $0x20] ss:$8 sps:$4 sm:$0xff]  }
  0x3c   :  { %1461 = vmatprep.subr.bf16.mxu0 %v1746_v0  ;;  %835 = vmatprep.subr.bf16.mxu1 %v1498_v16  ;;  %v1510_v20 = vld [vmem:[#allocation6 + $0x24] ss:$8 sps:$4 sm:$0xff]   ;;  %v1516_v22 = vld [vmem:[#allocation6 + $0x34] ss:$8 sps:$4 sm:$0xff]   ;;  %v1518_v23 = vld [vmem:[#allocation6 + $0x30] ss:$8 sps:$4 sm:$0xff]  }
  0x3d   :  { %836 = vmatpush1.bf16.msra.mxu1 %v1500_v17  ;;  %v1522_v24 = vld [vmem:[#allocation6 + $0x44] ss:$8 sps:$4 sm:$0xff]   ;;  %v1524_v25 = vld [vmem:[#allocation6 + $0x40] ss:$8 sps:$4 sm:$0xff]   ;;  %v1528_v26 = vld [vmem:[#allocation6 + $0x54] ss:$8 sps:$4 sm:$0xff]  }
  0x3e   :  { %837 = vmatprep.subr.bf16.mxu1 %v1504_v18  ;;  %v1530_v27 = vld [vmem:[#allocation6 + $0x50] ss:$8 sps:$4 sm:$0xff]   ;;  %v1534_v28 = vld [vmem:[#allocation6 + $0x64] ss:$8 sps:$4 sm:$0xff]   ;;  %v1536_v29 = vld [vmem:[#allocation6 + $0x60] ss:$8 sps:$4 sm:$0xff]  }
  0x3f   :  { %1462 = vmatpush3.bf16.msra.mxu0 %v123_v5  ;;  %v1540_v30 = vld [vmem:[#allocation6 + $0x74] ss:$8 sps:$4 sm:$0xff]   ;;  %v1542_v31 = vld [vmem:[#allocation6 + $0x70] ss:$8 sps:$4 sm:$0xff]   ;;  %v1546_v32 = vld [vmem:[#allocation6 + $0x84] ss:$8 sps:$4 sm:$0xff]  }
  0x40   :  { %233 = vmatprep.subr.bf16.mxu0 %v1485_v4  ;;  %v1548_v33 = vld [vmem:[#allocation6 + $0x80] ss:$8 sps:$4 sm:$0xff]   ;;  %v1552_v34 = vld [vmem:[#allocation6 + $0x94] ss:$8 sps:$4 sm:$0xff]   ;;  %v1554_v35 = vld [vmem:[#allocation6 + $0x90] ss:$8 sps:$4 sm:$0xff]  }
  0x41   :  { %838 = vmatpush1.bf16.msra.mxu1 %v1506_v19  ;;  %v1558_v36 = vld [vmem:[#allocation6 + $0xa4] ss:$8 sps:$4 sm:$0xff]   ;;  %v1560_v37 = vld [vmem:[#allocation6 + $0xa0] ss:$8 sps:$4 sm:$0xff]   ;;  %v1564_v38 = vld [vmem:[#allocation6 + $0xb4] ss:$8 sps:$4 sm:$0xff]  }
  0x42   :  { %1464 = vmatmul.mubr.msk.bf16.vlgmr.msra.gmra.mrb[0].mxu0 %vm117_vm2, %v1482_v6  ;;  %839 = vmatprep.subr.bf16.mxu1 %v1510_v20  ;;  %v1566_v39 = vld [vmem:[#allocation6 + $0xb0] ss:$8 sps:$4 sm:$0xff]   ;;  %v1570_v40 = vld [vmem:[#allocation6 + $0xc4] ss:$8 sps:$4 sm:$0xff]   ;;  %v1572_v41 = vld [vmem:[#allocation6 + $0xc0] ss:$8 sps:$4 sm:$0xff]  }
  0x43   :  { %234 = vmatpush1.bf16.msra.mxu0 %v1483_v7  ;;  %265 = vmatprep.mubr.bf16.mxu0 %v1748_v14  ;;  %v1576_v42 = vld [vmem:[#allocation6 + $0xd4] ss:$8 sps:$4 sm:$0xff]   ;;  %v1578_v43 = vld [vmem:[#allocation6 + $0xd0] ss:$8 sps:$4 sm:$0xff]   ;;  %v1297_v44 = vld [vmem:[%s2007_s4] ss:$0 sm:$0xff] }
  0x44   :  { %235 = vmatprep.subr.bf16.mxu0 %v1488_v8  ;;  %v1495_v53 = vld [vmem:[#allocation2] ss:$8 sps:$4 sm:$0xff]   ;;  %v1503_v55 = vld [vmem:[#allocation2 + $0x14] ss:$8 sps:$4 sm:$0xff]   ;;  %v1501_v56 = vld [vmem:[#allocation2 + $0x10] ss:$8 sps:$4 sm:$0xff]  }
  0x45   :  { %840 = vmatpush1.bf16.msra.mxu1 %v1512_v21  ;;  %v1509_v57 = vld [vmem:[#allocation2 + $0x24] ss:$8 sps:$4 sm:$0xff]   ;;  %v1507_v58 = vld [vmem:[#allocation2 + $0x20] ss:$8 sps:$4 sm:$0xff]   ;;  %v1515_v59 = vld [vmem:[#allocation2 + $0x34] ss:$8 sps:$4 sm:$0xff]  }
  0x46   :  { %841 = vmatprep.subr.bf16.mxu1 %v1516_v22  ;;  %v1513_v60 = vld [vmem:[#allocation2 + $0x30] ss:$8 sps:$4 sm:$0xff]   ;;  %v1521_v61 = vld [vmem:[#allocation2 + $0x44] ss:$8 sps:$4 sm:$0xff]   ;;  %v1519_v62 = vld [vmem:[#allocation2 + $0x40] ss:$8 sps:$4 sm:$0xff]  }
  0x47   :  { %236 = vmatpush1.bf16.msra.mxu0 %v1486_v9  ;;  %v1527_v63 = vld [vmem:[#allocation2 + $0x54] ss:$8 sps:$4 sm:$0xff]   ;;  %v1525_v0 = vld [vmem:[#allocation2 + $0x50] ss:$8 sps:$4 sm:$0xff]   ;;  %v1533_v1 = vld [vmem:[#allocation2 + $0x64] ss:$8 sps:$4 sm:$0xff]  }
  0x48   :  { %237 = vmatprep.subr.bf16.mxu0 %v1491_v10  ;;  %v1531_v2 = vld [vmem:[#allocation2 + $0x60] ss:$8 sps:$4 sm:$0xff]   ;;  %v1539_v3 = vld [vmem:[#allocation2 + $0x74] ss:$8 sps:$4 sm:$0xff]   ;;  %v1537_v4 = vld [vmem:[#allocation2 + $0x70] ss:$8 sps:$4 sm:$0xff]  }
  0x49   :  { %842 = vmatpush1.bf16.msra.mxu1 %v1518_v23  ;;  %v1545_v5 = vld [vmem:[#allocation2 + $0x84] ss:$8 sps:$4 sm:$0xff]   ;;  %v1543_v6 = vld [vmem:[#allocation2 + $0x80] ss:$8 sps:$4 sm:$0xff]   ;;  %v1551_v7 = vld [vmem:[#allocation2 + $0x94] ss:$8 sps:$4 sm:$0xff]  }
  0x4a   :  { %843 = vmatprep.subr.bf16.mxu1 %v1522_v24  ;;  %v1549_v8 = vld [vmem:[#allocation2 + $0x90] ss:$8 sps:$4 sm:$0xff]   ;;  %v1557_v9 = vld [vmem:[#allocation2 + $0xa4] ss:$8 sps:$4 sm:$0xff]   ;;  %v1555_v10 = vld [vmem:[#allocation2 + $0xa0] ss:$8 sps:$4 sm:$0xff]  }
  0x4b   :  { %238 = vmatpush1.bf16.msra.mxu0 %v1489_v11  ;;  %v1563_v11 = vld [vmem:[#allocation2 + $0xb4] ss:$8 sps:$4 sm:$0xff]   ;;  %v1567_v14 = vld [vmem:[#allocation2 + $0xc0] ss:$8 sps:$4 sm:$0xff]   ;;  %v1573_v16 = vld [vmem:[#allocation2 + $0xd0] ss:$8 sps:$4 sm:$0xff]  }
  0x4c   :  { %239 = vmatprep.subr.bf16.mxu0 %v1494_v12  ;;  %v1561_v12 = vld [vmem:[#allocation2 + $0xb0] ss:$8 sps:$4 sm:$0xff]   ;;  %v1581_v17 = vld [vmem:[#allocation2 + $0xe4] ss:$8 sps:$4 sm:$0xff]   ;;  %v1579_v19 = vld [vmem:[#allocation2 + $0xe0] ss:$8 sps:$4 sm:$0xff]  }
  0x4d   :  { %844 = vmatpush1.bf16.msra.mxu1 %v1524_v25  ;;  %v1582_v18 = vld [vmem:[#allocation6 + $0xe4] ss:$8 sps:$4 sm:$0xff]   ;;  %v1584_v20 = vld [vmem:[#allocation6 + $0xe0] ss:$8 sps:$4 sm:$0xff]   ;;  %v1587_v21 = vld [vmem:[#allocation2 + $0xf4] ss:$8 sps:$4 sm:$0xff]  }
  0x4e   :  { %845 = vmatprep.subr.bf16.mxu1 %v1528_v26  ;;  %v1588_v22 = vld [vmem:[#allocation6 + $0xf4] ss:$8 sps:$4 sm:$0xff]   ;;  %v1585_v23 = vld [vmem:[#allocation2 + $0xf0] ss:$8 sps:$4 sm:$0xff]   ;;  %v1593_v25 = vld [vmem:[#allocation4 + $0x4] ss:$8 sps:$4 sm:$0xff]   ;;  %v179_v26 = vlaneseq }
  0x4f   :  { %240 = vmatpush1.bf16.msra.mxu0 %v1492_v13  ;;  %v1569_v13 = vld [vmem:[#allocation2 + $0xc4] ss:$8 sps:$4 sm:$0xff]   ;;  %v1590_v24 = vld [vmem:[#allocation6 + $0xf0] ss:$8 sps:$4 sm:$0xff]   ;;  %vm1285_vm6 = vcmask 31744   ;;  %vm1288_vm7 = vcmask 7168  }
  0x50   :  { %562 = vmatprep.subr.bf16.mxu0 %v1497_v15  ;;  %v1575_v15 = vld [vmem:[#allocation2 + $0xd4] ss:$8 sps:$4 sm:$0xff]  }
  0x51   :  { %846 = vmatpush1.bf16.msra.mxu1 %v1530_v27  ;;  %v180_v27 = vshrl.u32 %v179_v26, 7 }
  0x52   :  { %847 = vmatprep.subr.bf16.mxu1 %v1534_v28 }
  0x53   :  { %v1905_v28 = vsub.s32 0, %v180_v27 }
  0x55   :  { %848 = vmatpush1.bf16.msra.mxu1 %v1536_v29  ;;  %v177_v29 = vld [vmem:[%s2009_s6] sm:$0x3] }
  0x56   :  { %849 = vmatprep.subr.bf16.mxu1 %v1540_v30  ;;  %v1910_v30 = vsub.s32 1, %v180_v27 }
  0x59   :  { %850 = vmatpush1.bf16.msra.mxu1 %v1542_v31  ;;  %v182_v31 = vrot.slane %v177_v29, %v1905_v28 }
  0x5a   :  { %851 = vmatprep.subr.bf16.mxu1 %v1546_v32 }
  0x5d   :  { %852 = vmatpush1.bf16.msra.mxu1 %v1548_v33  ;;  %v186_v33 = vrot.slane %v177_v29, %v1910_v30 }
  0x5e   :  { %853 = vmatprep.subr.bf16.mxu1 %v1552_v34 }
  0x61   :  { %854 = vmatpush1.bf16.msra.mxu1 %v1554_v35 }
  0x62   :  { %855 = vmatprep.subr.bf16.mxu1 %v1558_v36 }
  0x65   :  { %856 = vmatpush1.bf16.msra.mxu1 %v1560_v37 }
  0x66   :  { %857 = vmatprep.subr.bf16.mxu1 %v1564_v38 }
  0x69   :  { %858 = vmatpush1.bf16.msra.mxu1 %v1566_v39 }
  0x6a   :  { %859 = vmatprep.subr.bf16.mxu1 %v1570_v40 }
  0x6d   :  { %860 = vmatpush1.bf16.msra.mxu1 %v1572_v41 }
  0x6e   :  { %861 = vmatprep.subr.bf16.mxu1 %v1576_v42 }
  0x71   :  { %862 = vmatpush1.bf16.msra.mxu1 %v1578_v43  ;;  %v1591_v43 = vld [vmem:[#allocation4] ss:$8 sps:$4 sm:$0xff]  }
  0x72   :  { %863 = vmatprep.subr.bf16.mxu1 %v1582_v18  ;;  %v1647_v18 = vld [vmem:[%s2013_s10 + $0x60] sm:$0xff]  }
  0x75   :  { %864 = vmatpush1.bf16.msra.mxu1 %v1584_v20  ;;  %v1649_v20 = vld [vmem:[%s2013_s10 + $0x68] sm:$0xff]  }
  0x76   :  { %865 = vmatprep.subr.bf16.mxu1 %v1588_v22 }
  0x79   :  { %866 = vmatpush1.bf16.msra.mxu1 %v1590_v24 }
  0x7a   :  { %1038 = vmatprep.subr.bf16.mxu1 %v1593_v25 }
 0x115   :  { %v159_v45 = vpop.f32.mrb[0].mxu0 }
 0x116   :  { %v160_v46 = vadd.f32 %v1297_v44, %v159_v45  ;;  %v1465_v47 = vpop.f32.mrb[1].mxu0  ;;  %v1594_v45 = vld [vmem:[#allocation4 + $0x10] ss:$8 sps:$4 sm:$0xff]  }
 0x117   :  { %v162_v48 = vpop.f32.mrb[2].mxu0  ;;  %v1597_v47 = vld [vmem:[#allocation4 + $0x20] ss:$8 sps:$4 sm:$0xff]  }
 0x118   :  { %v163_v49 = vadd.f32 %v1297_v44, %v162_v48  ;;  %v1466_v50 = vpop.f32.mrb[3].mxu0  ;;  %v166_v51 = vmax.f32 %v160_v46, 0.0  ;;  %v1596_v44 = vld [vmem:[#allocation4 + $0x14] ss:$8 sps:$4 sm:$0xff]   ;;  %v1599_v46 = vld [vmem:[#allocation4 + $0x24] ss:$8 sps:$4 sm:$0xff]  }
 0x119   :  { %v1602_v48 = vld [vmem:[#allocation4 + $0x34] ss:$8 sps:$4 sm:$0xff]   ;;  %v1605_v50 = vld [vmem:[#allocation4 + $0x44] ss:$8 sps:$4 sm:$0xff]  }
 0x11a   :  { %v167_v52 = vmax.f32 %v163_v49, 0.0  ;;  %v1600_v49 = vld [vmem:[#allocation4 + $0x30] ss:$8 sps:$4 sm:$0xff]  }
 0x11c   :  { %v168_v54 = vpack.c.bf16 %v167_v52, %v166_v51  ;;  %v1603_v51 = vld [vmem:[#allocation4 + $0x40] ss:$8 sps:$4 sm:$0xff]   ;;  %v1608_v52 = vld [vmem:[#allocation4 + $0x54] ss:$8 sps:$4 sm:$0xff]  }
 0x11e   :  { %1311 = vmatmul.mubr.msk.bf16.vlgmr.msra.gmra.mrb[4].mxu0 %vm229_vm3, %v168_v54  ;;  %v1611_v54 = vld [vmem:[#allocation4 + $0x64] ss:$8 sps:$4 sm:$0xff]  }
 0x11f   :  { %563 = vmatpush1.bf16.msra.mxu0 %v1495_v53  ;;  %v1606_v53 = vld [vmem:[#allocation4 + $0x50] ss:$8 sps:$4 sm:$0xff]  }
 0x120   :  { %564 = vmatprep.subr.bf16.mxu0 %v1503_v55  ;;  %v1609_v55 = vld [vmem:[#allocation4 + $0x60] ss:$8 sps:$4 sm:$0xff]  }
 0x123   :  { %565 = vmatpush1.bf16.msra.mxu0 %v1501_v56  ;;  %v1614_v56 = vld [vmem:[#allocation4 + $0x74] ss:$8 sps:$4 sm:$0xff]  }
 0x124   :  { %566 = vmatprep.subr.bf16.mxu0 %v1509_v57  ;;  %v1612_v57 = vld [vmem:[#allocation4 + $0x70] ss:$8 sps:$4 sm:$0xff]  }
 0x127   :  { %567 = vmatpush1.bf16.msra.mxu0 %v1507_v58  ;;  %v1617_v58 = vld [vmem:[#allocation4 + $0x84] ss:$8 sps:$4 sm:$0xff]  }
 0x128   :  { %568 = vmatprep.subr.bf16.mxu0 %v1515_v59  ;;  %v1615_v59 = vld [vmem:[#allocation4 + $0x80] ss:$8 sps:$4 sm:$0xff]  }
 0x12b   :  { %569 = vmatpush1.bf16.msra.mxu0 %v1513_v60  ;;  %v1620_v60 = vld [vmem:[#allocation4 + $0x94] ss:$8 sps:$4 sm:$0xff]  }
 0x12c   :  { %570 = vmatprep.subr.bf16.mxu0 %v1521_v61  ;;  %v1618_v61 = vld [vmem:[#allocation4 + $0x90] ss:$8 sps:$4 sm:$0xff]  }
 0x12f   :  { %571 = vmatpush1.bf16.msra.mxu0 %v1519_v62  ;;  %v1623_v62 = vld [vmem:[#allocation4 + $0xa4] ss:$8 sps:$4 sm:$0xff]  }
 0x130   :  { %572 = vmatprep.subr.bf16.mxu0 %v1527_v63  ;;  %v1621_v63 = vld [vmem:[#allocation4 + $0xa0] ss:$8 sps:$4 sm:$0xff]  }
 0x133   :  { %573 = vmatpush1.bf16.msra.mxu0 %v1525_v0  ;;  %v1626_v0 = vld [vmem:[#allocation4 + $0xb4] ss:$8 sps:$4 sm:$0xff]  }
 0x134   :  { %574 = vmatprep.subr.bf16.mxu0 %v1533_v1  ;;  %v1624_v1 = vld [vmem:[#allocation4 + $0xb0] ss:$8 sps:$4 sm:$0xff]  }
 0x137   :  { %575 = vmatpush1.bf16.msra.mxu0 %v1531_v2  ;;  %v1629_v2 = vld [vmem:[#allocation4 + $0xc4] ss:$8 sps:$4 sm:$0xff]  }
 0x138   :  { %576 = vmatprep.subr.bf16.mxu0 %v1539_v3  ;;  %v1627_v3 = vld [vmem:[#allocation4 + $0xc0] ss:$8 sps:$4 sm:$0xff]  }
 0x13b   :  { %577 = vmatpush1.bf16.msra.mxu0 %v1537_v4  ;;  %v1632_v4 = vld [vmem:[#allocation4 + $0xd4] ss:$8 sps:$4 sm:$0xff]  }
 0x13c   :  { %578 = vmatprep.subr.bf16.mxu0 %v1545_v5  ;;  %v1630_v5 = vld [vmem:[#allocation4 + $0xd0] ss:$8 sps:$4 sm:$0xff]  }
 0x13f   :  { %579 = vmatpush1.bf16.msra.mxu0 %v1543_v6  ;;  %v1635_v6 = vld [vmem:[#allocation4 + $0xe4] ss:$8 sps:$4 sm:$0xff]  }
 0x140   :  { %580 = vmatprep.subr.bf16.mxu0 %v1551_v7  ;;  %v1633_v7 = vld [vmem:[#allocation4 + $0xe0] ss:$8 sps:$4 sm:$0xff]  }
 0x143   :  { %581 = vmatpush1.bf16.msra.mxu0 %v1549_v8  ;;  %v1638_v8 = vld [vmem:[#allocation4 + $0xf4] ss:$8 sps:$4 sm:$0xff]  }
 0x144   :  { %582 = vmatprep.subr.bf16.mxu0 %v1557_v9  ;;  %v1636_v9 = vld [vmem:[#allocation4 + $0xf0] ss:$8 sps:$4 sm:$0xff]  }
 0x147   :  { %583 = vmatpush1.bf16.msra.mxu0 %v1555_v10  ;;  %v1639_v10 = vld [vmem:[%s2013_s10 + $0x40] sm:$0xff]  }
 0x148   :  { %584 = vmatprep.subr.bf16.mxu0 %v1563_v11  ;;  %v1640_v11 = vld [vmem:[%s2013_s10] sm:$0xff]  }
 0x14b   :  { %585 = vmatpush1.bf16.msra.mxu0 %v1561_v12  ;;  %v1641_v12 = vld [vmem:[%s2013_s10 + $0x48] sm:$0xff]  }
 0x14c   :  { %586 = vmatprep.subr.bf16.mxu0 %v1569_v13  ;;  %v1642_v13 = vld [vmem:[%s2013_s10 + $0x8] sm:$0xff]  }
 0x14f   :  { %587 = vmatpush1.bf16.msra.mxu0 %v1567_v14  ;;  %v1643_v14 = vld [vmem:[%s2013_s10 + $0x50] sm:$0xff]  }
 0x150   :  { %588 = vmatprep.subr.bf16.mxu0 %v1575_v15  ;;  %v1644_v15 = vld [vmem:[%s2013_s10 + $0x10] sm:$0xff]  }
 0x153   :  { %589 = vmatpush1.bf16.msra.mxu0 %v1573_v16  ;;  %v1645_v16 = vld [vmem:[%s2013_s10 + $0x58] sm:$0xff]  }
 0x154   :  { %590 = vmatprep.subr.bf16.mxu0 %v1581_v17  ;;  %v1646_v17 = vld [vmem:[%s2013_s10 + $0x18] sm:$0xff]  }
 0x157   :  { %591 = vmatpush1.bf16.msra.mxu0 %v1579_v19  ;;  %v1648_v19 = vld [vmem:[%s2013_s10 + $0x20] sm:$0xff]  }
 0x158   :  { %592 = vmatprep.subr.bf16.mxu0 %v1587_v21  ;;  %v1312_v21 = vld.sshfl [vmem:[%s2004_s1] sm:$0x33 pattern:$0x75316420] }
 0x159   :  { %v317_v22 = vcombine.high %v1312_v21, %v1312_v21  ;;  %v325_v24 = vrot.slane %v1312_v21, %v1910_v30 }
 0x15b   :  { %593 = vmatpush1.bf16.msra.mxu0 %v1585_v23  ;;  %v321_v23 = vrot.slane %v1312_v21, %v1905_v28  ;;  %v329_v25 = vrot.slane %v317_v22, %v1905_v28  ;;  %v333_v27 = vrot.slane %v317_v22, %v1910_v30 }
 0x15c   :  { %1435 = vmatprep.subr.bf16.mxu0 %v1639_v10 }
 0x1f1   :  { %v267_v32 = vpop.f32.mrb[4].mxu0 }
 0x1f2   :  { %v269_v34 = vpop.f32.mrb[5].mxu0  ;;  %v1914_v36 = vadd.f32 %v267_v32, %v182_v31 }
 0x1f3   :  { %v271_v35 = vpop.f32.mrb[6].mxu0  ;;  %v270_v39 = vadd.f32 %v269_v34, %v186_v33 }
 0x1f4   :  { %v1916_v37 = vadd.f32 %v271_v35, %v182_v31  ;;  %v273_v38 = vpop.f32.mrb[7].mxu0 }
 0x1f5   :  { %v274_v40 = vadd.f32 %v273_v38, %v186_v33 }
 0x1f6   :  { %v368_v41 = vpack.c.bf16 %v1916_v37, %v1914_v36 }
 0x1f7   :  { %v369_v42 = vpack.c.bf16 %v274_v40, %v270_v39 }
 0x1f9   :  { %594 = vmatprep.mubr.bf16.mxu0 %v369_v42  ;;  %867 = vmatprep.mubr.bf16.mxu1 %v369_v42 }
 0x1fa   :  { %595 = vmatmul.mubr.bf16.vlgmr.msra.gmra.mrb[8].mxu0 %v368_v41  ;;  %868 = vmatmul.mubr.bf16.vlgmr.msra.gmra.mrb[0].mxu1 %v368_v41 }
 0x1fb   :  { %1039 = vmatpush1.bf16.msra.mxu1 %v1591_v43  ;;  %1436 = vmatpush3.bf16.msra.mxu0 %v1640_v11 }
 0x1fc   :  { %1040 = vmatprep.subr.bf16.mxu1 %v1596_v44  ;;  %1437 = vmatprep.subr.bf16.mxu0 %v1641_v12 }
 0x1ff   :  { %1041 = vmatpush1.bf16.msra.mxu1 %v1594_v45  ;;  %1438 = vmatpush3.bf16.msra.mxu0 %v1642_v13  ;;  %v1650_v45 = vld [vmem:[%s2013_s10 + $0x28] sm:$0xff]   ;;  %v1410_v13 = vld [vmem:[%s2014_s11] ss:$0 sm:$0xff] }
 0x200   :  { %1042 = vmatprep.subr.bf16.mxu1 %v1599_v46  ;;  %1439 = vmatprep.subr.bf16.mxu0 %v1643_v14  ;;  %v1651_v46 = vld [vmem:[%s2013_s10 + $0x70] sm:$0xff]  }
 0x203   :  { %1043 = vmatpush1.bf16.msra.mxu1 %v1597_v47  ;;  %1440 = vmatpush3.bf16.msra.mxu0 %v1644_v15  ;;  %v1652_v47 = vld [vmem:[%s2013_s10 + $0x30] sm:$0xff]  }
 0x204   :  { %1044 = vmatprep.subr.bf16.mxu1 %v1602_v48  ;;  %1441 = vmatprep.subr.bf16.mxu0 %v1645_v16  ;;  %v1653_v48 = vld [vmem:[%s2013_s10 + $0x78] sm:$0xff]  }
 0x207   :  { %1045 = vmatpush1.bf16.msra.mxu1 %v1600_v49  ;;  %1442 = vmatpush3.bf16.msra.mxu0 %v1646_v17  ;;  %v1654_v49 = vld [vmem:[%s2013_s10 + $0x38] sm:$0xff]  }
 0x208   :  { %1046 = vmatprep.subr.bf16.mxu1 %v1605_v50  ;;  %1443 = vmatprep.subr.bf16.mxu0 %v1647_v18  ;;  %v1313_v50 = vld.sshfl [vmem:[%s2005_s2] sm:$0x33 pattern:$0x75316420] }
 0x20b   :  { %1047 = vmatpush1.bf16.msra.mxu1 %v1603_v51  ;;  %1444 = vmatpush3.bf16.msra.mxu0 %v1648_v19  ;;  %v347_v51 = vcombine.high %v1313_v50, %v1313_v50 }
 0x20c   :  { %1048 = vmatprep.subr.bf16.mxu1 %v1608_v52  ;;  %1445 = vmatprep.subr.bf16.mxu0 %v1649_v20  ;;  %v351_v52 = vrot.slane %v1313_v50, %v1905_v28 }
 0x20f   :  { %1049 = vmatpush1.bf16.msra.mxu1 %v1606_v53  ;;  %1446 = vmatpush3.bf16.msra.mxu0 %v1650_v45  ;;  %v355_v53 = vrot.slane %v1313_v50, %v1910_v30 }
 0x210   :  { %1050 = vmatprep.subr.bf16.mxu1 %v1611_v54  ;;  %1447 = vmatprep.subr.bf16.mxu0 %v1651_v46  ;;  %v359_v54 = vrot.slane %v347_v51, %v1905_v28  ;;  %v276_v28 = vadd.f32 -1.0, %v1914_v36 }
 0x213   :  { %1051 = vmatpush1.bf16.msra.mxu1 %v1609_v55  ;;  %1448 = vmatpush3.bf16.msra.mxu0 %v1652_v47 }
 0x214   :  { %1052 = vmatprep.subr.bf16.mxu1 %v1614_v56  ;;  %1449 = vmatprep.subr.bf16.mxu0 %v1653_v48  ;;  %v363_v56 = vrot.slane %v347_v51, %v1910_v30  ;;  %v280_v30 = vand.u32 2147483647, %v276_v28 }
 0x217   :  { %1053 = vmatpush1.bf16.msra.mxu1 %v1612_v57  ;;  %1450 = vmatpush3.bf16.msra.mxu0 %v1654_v49  ;;  %v278_v49 = vmax.f32 %v276_v28, 0.0 }
 0x218   :  { %1054 = vmatprep.subr.bf16.mxu1 %v1617_v58 }
 0x21b   :  { %1055 = vmatpush1.bf16.msra.mxu1 %v1615_v59 }
 0x21c   :  { %1056 = vmatprep.subr.bf16.mxu1 %v1620_v60 }
 0x21f   :  { %1057 = vmatpush1.bf16.msra.mxu1 %v1618_v61 }
 0x220   :  { %1058 = vmatprep.subr.bf16.mxu1 %v1623_v62 }
 0x223   :  { %1059 = vmatpush1.bf16.msra.mxu1 %v1621_v63 }
 0x224   :  { %1060 = vmatprep.subr.bf16.mxu1 %v1626_v0 }
 0x227   :  { %1061 = vmatpush1.bf16.msra.mxu1 %v1624_v1 }
 0x228   :  { %1062 = vmatprep.subr.bf16.mxu1 %v1629_v2 }
 0x22b   :  { %1063 = vmatpush1.bf16.msra.mxu1 %v1627_v3 }
 0x22c   :  { %1064 = vmatprep.subr.bf16.mxu1 %v1632_v4 }
 0x22f   :  { %1065 = vmatpush1.bf16.msra.mxu1 %v1630_v5 }
 0x230   :  { %1066 = vmatprep.subr.bf16.mxu1 %v1635_v6  ;;  %v1984_v6 = vadd.f32 -1.0, %v1916_v37 }
 0x233   :  { %1067 = vmatpush1.bf16.msra.mxu1 %v1633_v7  ;;  %v281_v7 = vand.u32 2147483647, %v1984_v6 }
 0x234   :  { %1068 = vmatprep.subr.bf16.mxu1 %v1638_v8  ;;  %v282_v8 = vsub.f32 0.0, %v280_v30 }
 0x236   :  { %v284_v10 = vmul.f32 1.442695, %v282_v8 }
 0x237   :  { %1069 = vmatpush1.bf16.msra.mxu1 %v1636_v9  ;;  %v283_v9 = vsub.f32 0.0, %v281_v7 }
 0x238   :  { %1655 = vpow2.f32 %v284_v10 }
 0x239   :  { %v286_v11 = vmul.f32 1.442695, %v283_v9 }
 0x23b   :  { %1657 = vpow2.f32 %v286_v11 }
 0x242   :  { %v1656_v20 = vpop.eup %1655 }
 0x245   :  { %v1658_v22 = vpop.eup %1657 }
 0x2cd   :  { %v596_v26 = vpop.f32.mrb[8].mxu0 }
 0x2ce   :  { %v597_v29 = vadd.f32 %v596_v26, %v321_v23  ;;  %v598_v31 = vpop.f32.mrb[9].mxu0  ;;  %v288_v23 = vadd.f32 1.0, %v1656_v20 }
 0x2cf   :  { %v599_v32 = vadd.f32 %v598_v31, %v325_v24  ;;  %v600_v33 = vpop.f32.mrb[10].mxu0  ;;  %v297_v24 = vadd.f32 1.0, %v1658_v22  ;;  %v291_v31 = vmul.f32 -0.5, %v1656_v20 }
 0x2d0   :  { %v601_v34 = vadd.f32 %v600_v33, %v329_v25  ;;  %v602_v35 = vpop.f32.mrb[11].mxu0  ;;  %v605_v39 = vmax.f32 %v597_v29, 0.0 }
 0x2d1   :  { %v603_v38 = vadd.f32 %v602_v35, %v333_v27  ;;  %v606_v41 = vmax.f32 %v599_v32, 0.0  ;;  %v300_v32 = vmul.f32 -0.5, %v1658_v22 }
 0x2d2   :  { %v607_v40 = vmax.f32 %v601_v34, 0.0  ;;  %v292_v34 = vadd.f32 1.0, %v291_v31 }
 0x2d3   :  { %v608_v42 = vmax.f32 %v603_v38, 0.0  ;;  %v294_v38 = vand.u32 2147483647, %v1656_v20 }
 0x2d4   :  { %v609_v43 = vpack.c.bf16 %v607_v40, %v605_v39  ;;  %v301_v40 = vadd.f32 1.0, %v300_v32 }
 0x2d5   :  { %v610_v44 = vpack.c.bf16 %v608_v42, %v606_v41  ;;  %v303_v41 = vand.u32 2147483647, %v1658_v22  ;;  %v293_v42 = vmul.f32 %v1656_v20, %v292_v34  ;;  %vm295_vm4 = vcmp.lt.f32.partialorder %v294_v38, 0.0004427343 }
 0x2d6   :  { %v302_v46 = vmul.f32 %v1658_v22, %v301_v40 }
 0x2d7   :  { %1070 = vmatprep.mubr.bf16.mxu1 %v610_v44  ;;  %vm304_vm5 = vcmp.lt.f32.partialorder %v303_v41, 0.0004427343 }
 0x2d8   :  { %1071 = vmatmul.mubr.bf16.vlgmr.msra.gmra.mrb[0].mxu1 %v609_v43 }
 0x3ab   :  { %v1072_v55 = vpop.f32.mrb[0].mxu1 }
 0x3ac   :  { %v1081_v57 = vadd.f32 %v1072_v55, %v351_v52  ;;  %v1074_v58 = vpop.f32.mrb[1].mxu1 }
 0x3ad   :  { %v1082_v59 = vadd.f32 %v1074_v58, %v355_v53  ;;  %v1076_v60 = vpop.f32.mrb[2].mxu1 }
 0x3ae   :  { %v1083_v61 = vadd.f32 %v1076_v60, %v359_v54  ;;  %v1078_v62 = vpop.f32.mrb[3].mxu1  ;;  %v1085_v0 = vmax.f32 %v1081_v57, 0.0  ;;  %v279_v54 = vmax.f32 %v1984_v6, 0.0 }
 0x3af   :  { %v1084_v63 = vadd.f32 %v1078_v62, %v363_v56  ;;  %v1086_v2 = vmax.f32 %v1082_v59, 0.0 }
 0x3b0   :  { %v1087_v1 = vmax.f32 %v1083_v61, 0.0 }
 0x3b1   :  { %v1088_v3 = vmax.f32 %v1084_v63, 0.0 }
 0x3b2   :  { %v1089_v4 = vpack.c.bf16 %v1087_v1, %v1085_v0 }
 0x3b3   :  { %v1090_v5 = vpack.c.bf16 %v1088_v3, %v1086_v2 }
 0x3b5   :  { %1258 = vmatprep.mubr.bf16.mxu0 %v1090_v5 }
 0x3b6   :  { %1259 = vmatmul.mubr.bf16.vlgmr.msra.gmra.mrb[12].mxu0 %v1089_v4 }
 0x489   :  { %v1451_v12 = vpop.f32.mrb[12].mxu0 }
 0x48a   :  { %v1452_v14 = vpop.f32.mrb[13].mxu0 }
 0x48b   :  { %v1453_v15 = vadd.f32 %v1452_v14, %v1451_v12  ;;  %v1454_v36 = vpop.f32.mrb[14].mxu0 }
 0x48c   :  { %v1455_v16 = vpop.f32.mrb[15].mxu0 }
 0x48d   :  { %v1261_v37 = vadd.f32 %v1453_v15, %v1410_v13  ;;  %v1456_v17 = vadd.f32 %v1455_v16, %v1454_v36 }
 0x48f   :  { %v1427_v18 = vmul.f32 -1.442695, %v1261_v37  ;;  %v1264_v19 = vadd.f32 %v1456_v17, %v1410_v13 }
 0x491   :  { %1659 = vpow2.f32 %v1427_v18  ;;  %v1428_v21 = vmul.f32 -1.442695, %v1264_v19 }
 0x493   :  { %1661 = vpow2.f32 %v1428_v21 }
 0x494   :  { %1663 = vlog2.f32 %v288_v23 }
 0x495   :  { %1665 = vlog2.f32 %v297_v24 }
 0x49b   :  { %v1660_v25 = vpop.eup %1659 }
 0x49c   :  { %v1275_v26 = vadd.f32 1.0, %v1660_v25 }
 0x49d   :  { %v1662_v27 = vpop.eup %1661 }
 0x49e   :  { %1667 = vrcp.f32 %v1275_v26  ;;  %v1276_v29 = vadd.f32 1.0, %v1662_v27  ;;  %v1664_v33 = vpop.eup %1663 }
 0x49f   :  { %v1666_v35 = vpop.eup %1665  ;;  %v290_v39 = vmul.f32 0.6931472, %v1664_v33 }
 0x4a0   :  { %1669 = vrcp.f32 %v1276_v29  ;;  %v299_v43 = vmul.f32 0.6931472, %v1666_v35 }
 0x4a1   :  { %v296_v45 = vsel %vm295_vm4, %v293_v42, %v290_v39 }
 0x4a2   :  { %v305_v50 = vsel %vm304_vm5, %v302_v46, %v299_v43  ;;  %v306_v53 = vadd.f32 %v296_v45, %v278_v49 }
 0x4a3   :  { %v307_v56 = vadd.f32 %v305_v50, %v279_v54 }
 0x4a8   :  { %v1668_v44 = vpop.eup %1667 }
 0x4a9   :  { %v1281_v47 = vmul.f32 1.002, %v1668_v44 }
 0x4aa   :  { %v1670_v48 = vpop.eup %1669 }
 0x4ab   :  { %v1429_v51 = vadd.f32 -0.001, %v1281_v47  ;;  %v1282_v52 = vmul.f32 1.002, %v1670_v48 }
 0x4ad   :  { %1286 = vst.msk [vmem:[%s2015_s12] sm:$0xff] %vm1285_vm6, %v1429_v51  ;;  %v1430_v55 = vadd.f32 -0.001, %v1282_v52 }
 0x4ae   :  { %1289 = vst.msk [vmem:[%s2015_s12] sm:$0xff] %vm1288_vm7, %v306_v53 }
 0x4af   :  { %1287 = vst.msk [vmem:[%s2015_s12 + $0x8] sm:$0xff] %vm1285_vm6, %v1430_v55 }
 0x4b0   :  { %1290 = vst.msk [vmem:[%s2015_s12 + $0x8] sm:$0xff] %vm1288_vm7, %v307_v56 }
 0x4b1   :  { %1295 = vsyncpa [#allocation3], 1 }
 0x4b2   :  { %1296 = vsyncpa [#allocation5], 1 }

</bundles_post_ra>
